<compile_context>
chip_gen: v6e
topology: v6e:2x2x1
jax: 0.10.0
libtpu: 0.0.40
codegen_flags: <defaults>
</compile_context>

<pallas_src>
import math
import numpy as np
import jax
import jax.numpy as jnp
from jax import lax
from jax.experimental import pallas as pl
from jax.experimental.pallas import tpu as pltpu

# ----- static configuration (small synthetic shapes) -----
B, C, COUT = 2, 4, 8          # batch, in_channels, out_channels
H, W = 16, 16                 # Fi spatial size
h, w = 8, 8                   # Po spatial size (must differ from Fi's, see forward())
HW, hw = H * W, h * w
EPS = 1e-5                    # BatchNorm eps


def _gca_k(channel):
    t = int(abs((math.log(channel, 2) + 1) / 2))
    return t if t % 2 else t + 1


K1D = _gca_k(C)               # GCA conv1d kernel size (k=1 for C=4)
PAD1D = (K1D - 1) // 2


def _bilinear_matrix(out_size, in_size):
    """Row-stochastic matrix reproducing F.interpolate(mode='bilinear', align_corners=False)."""
    m = np.zeros((out_size, in_size), np.float32)
    scale = in_size / out_size
    for i in range(out_size):
        src = max((i + 0.5) * scale - 0.5, 0.0)
        i0 = min(int(np.floor(src)), in_size - 1)
        i1 = min(i0 + 1, in_size - 1)
        t = src - i0
        m[i, i0] += 1.0 - t
        m[i, i1] += t
    return m


def _tap_masks():
    """(9, H*W) 0/1 masks: tap t = dy*3+dx (offsets dy-1, dx-1) is valid at flat position p."""
    m = np.zeros((9, HW), np.float32)
    for dy in range(3):
        for dx in range(3):
            t = dy * 3 + dx
            for y in range(H):
                for x in range(W):
                    if 0 <= y + dy - 1 < H and 0 <= x + dx - 1 < W:
                        m[t, y * W + x] = 1.0
    return m


_TAP_MASK = jnp.asarray(_tap_masks())


# ----------------------------------------------------------------------------- kernel helpers
def _shift_lanes(x, s):
    """y[:, p] = x[:, p + s] with zero fill (static lane shift on the flat H*W layout)."""
    if s == 0:
        return x
    z = jnp.zeros((x.shape[0], abs(s)), jnp.float32)
    if s > 0:
        return jnp.concatenate([x[:, s:], z], axis=1)
    return jnp.concatenate([z, x[:, :s]], axis=1)


# ----------------------------------------------------------------------------- the kernel
def asm_kernel(fi_ref, po_ref, mt_ref, mask_ref, wconv_ref, shift_ref,
               wsa1_ref, bsa1_ref, w1m_ref, wfin_ref, bfin_ref, out_ref):
    fi = fi_ref[...]                                                 # (C, HW)

    # bilinear upsample of the prior as one MXU matmul: (1, h*w) @ (h*w, HW)
    po_up = jnp.dot(po_ref[...], mt_ref[...],
                    preferred_element_type=jnp.float32)              # (1, HW)

    # SA input Fu = Fi*(1 - Po_up), GCA input Fl = Fi*(1 + Po_up), stacked on sublanes
    x = jnp.concatenate([fi * (1.0 - po_up), fi * (1.0 + po_up)], axis=0)   # (2C, HW)

    # im2col: 9 lane-shifted copies (+ row-wrap masks) stacked into (9*2C, HW)
    taps = []
    for t in range(9):
        ody, odx = t // 3 - 1, t % 3 - 1
        tap = _shift_lanes(x, ody * W + odx)
        if odx != 0:                       # zero-fill already handles the dy boundary
            tap = tap * mask_ref[t:t + 1, :]
        taps.append(tap)
    tapmat = jnp.concatenate(taps, axis=0)                           # (18C, HW)

    # both 3x3 ConvBNR branches as one MXU matmul (BN scale pre-folded), + shift + ReLU
    y = jnp.dot(wconv_ref[...], tapmat, preferred_element_type=jnp.float32)
    y = jnp.maximum(y + shift_ref[...], 0.0)                         # (2C, HW)
    xs = y[:C, :]                                                    # SA branch
    xg = y[C:, :]                                                    # GCA branch

    # SA gate: [channel-avg ; channel-max] -> 1x1 conv (2->C) -> sigmoid
    cat = jnp.concatenate([jnp.mean(xs, axis=0, keepdims=True),
                           jnp.max(xs, axis=0, keepdims=True)], axis=0)     # (2, HW)
    ws = jax.nn.sigmoid(jnp.dot(wsa1_ref[...], cat,
                                preferred_element_type=jnp.float32)
                        + bsa1_ref[...])                             # (C, HW)
    fs = xs * ws

    # GCA gate: global-avg-pool -> conv1d over channels (band matrix) -> sigmoid
    # (band matrix applied before the spatial mean; identical by linearity)
    t2 = jnp.dot(w1m_ref[...], xg, preferred_element_type=jnp.float32)
    wei = jax.nn.sigmoid(jnp.sum(t2, axis=1, keepdims=True) * (1.0 / HW))   # (C, 1)
    fg = xg * wei

    # final 1x1 conv over channels -> lane-dense (COUT, HW) output slab (unmasked stores)
    out_ref[...] = (jnp.dot(wfin_ref[...], fs + fg,
                            preferred_element_type=jnp.float32)
                    + bfin_ref[...])


# ----------------------------------------------------------------------------- wrapper
def asm_module_pallas(Fi, Po, P):
    fi2 = Fi.reshape(B, C, HW)                                       # lane-dense layout
    po2 = Po.reshape(B, 1, hw)

    # combined bilinear-interpolation matrix: po_up_flat = po_flat @ mt
    mt = jnp.kron(P['wy'], P['wxt'].T).T                             # (h*w, H*W)

    # fused SA/GCA 3x3 conv weight: BN scale folded, block-diagonal over branches,
    # column index = tap*2C + stacked-channel (matches the in-kernel tap matrix rows).
    wsa = P['w_sa3'].reshape(C, C, 9) * P['sa_scale'][:, None, None]
    wg = P['w_g3'].reshape(C, C, 9) * P['g_scale'][:, None, None]
    wbig = jnp.zeros((2 * C, 9, 2 * C), jnp.float32)
    wbig = wbig.at[:C, :, :C].set(jnp.transpose(wsa, (0, 2, 1)))
    wbig = wbig.at[C:, :, C:].set(jnp.transpose(wg, (0, 2, 1)))
    wbig = wbig.reshape(2 * C, 18 * C)
    shift = jnp.concatenate([P['sa_shift'], P['g_shift']])[:, None]  # (2C, 1)

    wsa1 = P['w_sa1'].reshape(C, 2)
    bsa1 = P['b_sa1'][:, None]

    # GCA conv1d over channels expressed as a (C, C) band matrix
    w1m = jnp.zeros((C, C), jnp.float32)
    for i in range(C):
        for j in range(K1D):
            cix = i + j - PAD1D
            if 0 <= cix < C:
                w1m = w1m.at[i, cix].set(P['w_1d'][j])

    wfin = P['w_fin'].reshape(COUT, C)
    bfin = P['b_fin'][:, None]

    def full(shape):
        return pl.BlockSpec(shape, lambda b: (0,) * len(shape))

    in_specs = [
        pl.BlockSpec((None, C, HW), lambda b: (b, 0, 0)),    # Fi (lane-dense)
        pl.BlockSpec((None, 1, hw), lambda b: (b, 0, 0)),    # Po (flattened prior)
        full((hw, HW)),          # interpolation matrix
        full((9, HW)),           # tap boundary masks
        full((2 * C, 18 * C)),   # fused 3x3 conv weights (BN scale folded)
        full((2 * C, 1)),        # fused BN shift
        full((C, 2)),            # SA 1x1 gate weight
        full((C, 1)),            # SA 1x1 gate bias
        full((C, C)),            # GCA conv1d band matrix
        full((COUT, C)),         # final 1x1 weight
        full((COUT, 1)),         # final 1x1 bias
    ]
    out_specs = pl.BlockSpec((None, COUT, HW), lambda b: (b, 0, 0))

    fn = pl.pallas_call(
        asm_kernel,
        out_shape=jax.ShapeDtypeStruct((B, COUT, HW), jnp.float32),
        grid=(B,),
        in_specs=in_specs,
        out_specs=out_specs,
        # independent batch steps: megacore-shardable on v7x, harmless on 1-TC chips
        compiler_params=pltpu.CompilerParams(dimension_semantics=("parallel",)),
    )
    out = fn(fi2, po2, mt, _TAP_MASK, wbig, shift, wsa1, bsa1, w1m, wfin, bfin)
    return out.reshape(B, COUT, H, W)


# ----------------------------------------------------------------------------- pure-JAX reference
def ref_forward(Fi, Po, P):
    po_up = jnp.einsum('Hh,bhw,wW->bHW', P['wy'], Po[:, 0], P['wxt'])[:, None]
    Fu = Fi * (1.0 - po_up)
    Fl = Fi * (1.0 + po_up)

    def convbnr(x, wflat, scale, shift):
        wk = wflat.reshape(C, C, 3, 3)
        y = lax.conv_general_dilated(x, wk, (1, 1), ((1, 1), (1, 1)),
                                     dimension_numbers=('NCHW', 'OIHW', 'NCHW'))
        y = y * scale[None, :, None, None] + shift[None, :, None, None]
        return jnp.maximum(y, 0.0)

    xs = convbnr(Fu, P['w_sa3'], P['sa_scale'], P['sa_shift'])
    cavg = jnp.mean(xs, axis=1, keepdims=True)
    cmax = jnp.max(xs, axis=1, keepdims=True)
    cat = jnp.concatenate([cavg, cmax], axis=1)
    ws = jnp.einsum('oc,bchw->bohw', P['w_sa1'].reshape(C, 2), cat) \
        + P['b_sa1'][None, :, None, None]
    fs = xs * jax.nn.sigmoid(ws)

    xg = convbnr(Fl, P['w_g3'], P['g_scale'], P['g_shift'])
    pooled = jnp.mean(xg, axis=(2, 3))                  # (B, C)
    pp = jnp.pad(pooled, ((0, 0), (PAD1D, PAD1D)))
    wei = jnp.zeros_like(pooled)
    for j in range(K1D):
        wei = wei + P['w_1d'][j] * pp[:, j:j + C]
    fg = xg * jax.nn.sigmoid(wei)[:, :, None, None]

    s = fs + fg
    return jnp.einsum('oc,bchw->bohw', P['w_fin'].reshape(COUT, C), s) \
        + P['b_fin'][None, :, None, None]


# ----------------------------------------------------------------------------- params
def make_params(keys):
    it = iter(keys)

    def nrm(shape, scale=0.2):
        return scale * jax.random.normal(next(it), shape, jnp.float32)

    def bn(ch):
        gamma = 1.0 + 0.1 * jax.random.normal(next(it), (ch,), jnp.float32)
        beta = 0.1 * jax.random.normal(next(it), (ch,), jnp.float32)
        rmean = 0.1 * jax.random.normal(next(it), (ch,), jnp.float32)
        rvar = jax.random.uniform(next(it), (ch,), jnp.float32, 0.5, 1.5)
        scale = gamma / jnp.sqrt(rvar + EPS)
        shift = beta - rmean * scale
        return scale, shift

    sa_scale, sa_shift = bn(C)
    g_scale, g_shift = bn(C)
    return dict(
        wy=jnp.asarray(_bilinear_matrix(H, h)),
        wxt=jnp.asarray(_bilinear_matrix(W, w).T),
        w_sa3=nrm((C * C * 9,)), sa_scale=sa_scale, sa_shift=sa_shift,
        w_sa1=nrm((C * 2,)), b_sa1=nrm((C,), 0.1),
        w_g3=nrm((C * C * 9,)), g_scale=g_scale, g_shift=g_shift,
        w_1d=nrm((K1D,), 0.5),
        w_fin=nrm((COUT * C,)), b_fin=nrm((COUT,), 0.1),
    )


if __name__ == "__main__":
    key = jax.random.PRNGKey(0)
    keys = jax.random.split(key, 20)
    Fi = jax.random.normal(keys[0], (B, C, H, W), jnp.float32)
    Po = jax.random.uniform(keys[1], (B, 1, h, w), jnp.float32)   # low-res prior mask
    params = make_params(keys[2:])

    out = asm_module_pallas(Fi, Po, params)
    out = jax.block_until_ready(out)

    ref = ref_forward(Fi, Po, params)
    np.testing.assert_allclose(np.asarray(out), np.asarray(ref), rtol=2e-3, atol=2e-3)
    assert out.shape == (B, COUT, H, W)
    print("KERNEL_OK")
</pallas_src>

<mosaic_0001>
module attributes {stable_mosaic.version = 11 : i64} {
  func.func @asm_kernel(%arg0: i32, %arg1: memref<1x4x256xf32, #tpu.memory_space<vmem>>, %arg2: memref<1x1x64xf32, #tpu.memory_space<vmem>>, %arg3: memref<64x256xf32, #tpu.memory_space<vmem>>, %arg4: memref<9x256xf32, #tpu.memory_space<vmem>>, %arg5: memref<8x72xf32, #tpu.memory_space<vmem>>, %arg6: memref<8x1xf32, #tpu.memory_space<vmem>>, %arg7: memref<4x2xf32, #tpu.memory_space<vmem>>, %arg8: memref<4x1xf32, #tpu.memory_space<vmem>>, %arg9: memref<4x4xf32, #tpu.memory_space<vmem>>, %arg10: memref<8x4xf32, #tpu.memory_space<vmem>>, %arg11: memref<8x1xf32, #tpu.memory_space<vmem>>, %arg12: memref<1x8x256xf32, #tpu.memory_space<vmem>>) attributes {dimension_semantics = [#tpu.dimension_semantics<parallel>], iteration_bounds = array<i64: 2>, scalar_prefetch = 0 : i64, scratch_operands = 0 : i64, tpu.core_type = #tpu.core_type<tc>, window_params = [{transform_indices = @transform_0, window_bounds = array<i64: 1, 4, 256>}, {transform_indices = @transform_1, window_bounds = array<i64: 1, 1, 64>}, {pipeline_mode = #tpu.pipeline_mode<synchronous>, transform_indices = @transform_2, window_bounds = array<i64: 64, 256>}, {pipeline_mode = #tpu.pipeline_mode<synchronous>, transform_indices = @transform_3, window_bounds = array<i64: 9, 256>}, {pipeline_mode = #tpu.pipeline_mode<synchronous>, transform_indices = @transform_4, window_bounds = array<i64: 8, 72>}, {pipeline_mode = #tpu.pipeline_mode<synchronous>, transform_indices = @transform_5, window_bounds = array<i64: 8, 1>}, {pipeline_mode = #tpu.pipeline_mode<synchronous>, transform_indices = @transform_6, window_bounds = array<i64: 4, 2>}, {pipeline_mode = #tpu.pipeline_mode<synchronous>, transform_indices = @transform_7, window_bounds = array<i64: 4, 1>}, {pipeline_mode = #tpu.pipeline_mode<synchronous>, transform_indices = @transform_8, window_bounds = array<i64: 4, 4>}, {pipeline_mode = #tpu.pipeline_mode<synchronous>, transform_indices = @transform_9, window_bounds = array<i64: 8, 4>}, {pipeline_mode = #tpu.pipeline_mode<synchronous>, transform_indices = @transform_10, window_bounds = array<i64: 8, 1>}, {transform_indices = @transform_11, window_bounds = array<i64: 1, 8, 256>}]} {
    %c0 = arith.constant 0 : index
    %c0_0 = arith.constant 0 : index
    %c0_1 = arith.constant 0 : index
    %0 = vector.load %arg1[%c0, %c0_0, %c0_1] : memref<1x4x256xf32, #tpu.memory_space<vmem>>, vector<1x4x256xf32>
    %1 = vector.shape_cast %0 : vector<1x4x256xf32> to vector<4x256xf32>
    %c0_2 = arith.constant 0 : index
    %c0_3 = arith.constant 0 : index
    %c0_4 = arith.constant 0 : index
    %2 = vector.load %arg2[%c0_2, %c0_3, %c0_4] : memref<1x1x64xf32, #tpu.memory_space<vmem>>, vector<1x1x64xf32>
    %3 = vector.shape_cast %2 : vector<1x1x64xf32> to vector<1x64xf32>
    %c0_5 = arith.constant 0 : index
    %c0_6 = arith.constant 0 : index
    %4 = vector.load %arg3[%c0_5, %c0_6] : memref<64x256xf32, #tpu.memory_space<vmem>>, vector<64x256xf32>
    %cst = arith.constant dense<0.000000e+00> : vector<1x256xf32>
    %5 = tpu.matmul %3, %4, %cst {dimension_numbers = #tpu.dot_dimension_numbers<[1], [0], [0], [1], [0, 0, 1, 1], [], []>} : vector<1x64xf32>, vector<64x256xf32>, vector<1x256xf32> -> vector<1x256xf32>
    %cst_7 = arith.constant 1.000000e+00 : f32
    %6 = vector.broadcast %cst_7 : f32 to vector<1x256xf32>
    %7 = arith.subf %6, %5 : vector<1x256xf32>
    %8 = vector.broadcast %7 : vector<1x256xf32> to vector<4x256xf32>
    %9 = arith.mulf %1, %8 : vector<4x256xf32>
    %cst_8 = arith.constant 1.000000e+00 : f32
    %10 = vector.broadcast %cst_8 : f32 to vector<1x256xf32>
    %11 = arith.addf %10, %5 : vector<1x256xf32>
    %12 = vector.broadcast %11 : vector<1x256xf32> to vector<4x256xf32>
    %13 = arith.mulf %1, %12 : vector<4x256xf32>
    %14 = tpu.concatenate %9, %13 in 0 : vector<4x256xf32>, vector<4x256xf32> -> vector<8x256xf32>
    %cst_9 = arith.constant 0.000000e+00 : f32
    %15 = vector.broadcast %cst_9 : f32 to vector<8x17xf32>
    %16 = vector.extract_strided_slice %14 {offsets = [0, 0], sizes = [8, 239], strides = [1, 1]} : vector<8x256xf32> to vector<8x239xf32>
    %17 = tpu.concatenate %15, %16 in 1 : vector<8x17xf32>, vector<8x239xf32> -> vector<8x256xf32>
    %c0_10 = arith.constant 0 : index
    %c0_11 = arith.constant 0 : index
    %18 = vector.load %arg4[%c0_10, %c0_11] : memref<9x256xf32, #tpu.memory_space<vmem>>, vector<1x256xf32>
    %19 = vector.broadcast %18 : vector<1x256xf32> to vector<8x256xf32>
    %20 = arith.mulf %17, %19 : vector<8x256xf32>
    %cst_12 = arith.constant 0.000000e+00 : f32
    %21 = vector.broadcast %cst_12 : f32 to vector<8x16xf32>
    %22 = vector.extract_strided_slice %14 {offsets = [0, 0], sizes = [8, 240], strides = [1, 1]} : vector<8x256xf32> to vector<8x240xf32>
    %23 = tpu.concatenate %21, %22 in 1 : vector<8x16xf32>, vector<8x240xf32> -> vector<8x256xf32>
    %cst_13 = arith.constant 0.000000e+00 : f32
    %24 = vector.broadcast %cst_13 : f32 to vector<8x15xf32>
    %25 = vector.extract_strided_slice %14 {offsets = [0, 0], sizes = [8, 241], strides = [1, 1]} : vector<8x256xf32> to vector<8x241xf32>
    %26 = tpu.concatenate %24, %25 in 1 : vector<8x15xf32>, vector<8x241xf32> -> vector<8x256xf32>
    %c2 = arith.constant 2 : index
    %c0_14 = arith.constant 0 : index
    %27 = vector.load %arg4[%c2, %c0_14] : memref<9x256xf32, #tpu.memory_space<vmem>>, vector<1x256xf32>
    %28 = vector.broadcast %27 : vector<1x256xf32> to vector<8x256xf32>
    %29 = arith.mulf %26, %28 : vector<8x256xf32>
    %cst_15 = arith.constant 0.000000e+00 : f32
    %30 = vector.broadcast %cst_15 : f32 to vector<8x1xf32>
    %31 = vector.extract_strided_slice %14 {offsets = [0, 0], sizes = [8, 255], strides = [1, 1]} : vector<8x256xf32> to vector<8x255xf32>
    %32 = tpu.concatenate %30, %31 in 1 : vector<8x1xf32>, vector<8x255xf32> -> vector<8x256xf32>
    %c3 = arith.constant 3 : index
    %c0_16 = arith.constant 0 : index
    %33 = vector.load %arg4[%c3, %c0_16] : memref<9x256xf32, #tpu.memory_space<vmem>>, vector<1x256xf32>
    %34 = vector.broadcast %33 : vector<1x256xf32> to vector<8x256xf32>
    %35 = arith.mulf %32, %34 : vector<8x256xf32>
    %cst_17 = arith.constant 0.000000e+00 : f32
    %36 = vector.broadcast %cst_17 : f32 to vector<8x1xf32>
    %37 = vector.extract_strided_slice %14 {offsets = [0, 1], sizes = [8, 255], strides = [1, 1]} : vector<8x256xf32> to vector<8x255xf32>
    %38 = tpu.concatenate %37, %36 in 1 : vector<8x255xf32>, vector<8x1xf32> -> vector<8x256xf32>
    %c5 = arith.constant 5 : index
    %c0_18 = arith.constant 0 : index
    %39 = vector.load %arg4[%c5, %c0_18] : memref<9x256xf32, #tpu.memory_space<vmem>>, vector<1x256xf32>
    %40 = vector.broadcast %39 : vector<1x256xf32> to vector<8x256xf32>
    %41 = arith.mulf %38, %40 : vector<8x256xf32>
    %cst_19 = arith.constant 0.000000e+00 : f32
    %42 = vector.broadcast %cst_19 : f32 to vector<8x15xf32>
    %43 = vector.extract_strided_slice %14 {offsets = [0, 15], sizes = [8, 241], strides = [1, 1]} : vector<8x256xf32> to vector<8x241xf32>
    %44 = tpu.concatenate %43, %42 in 1 : vector<8x241xf32>, vector<8x15xf32> -> vector<8x256xf32>
    %c6 = arith.constant 6 : index
    %c0_20 = arith.constant 0 : index
    %45 = vector.load %arg4[%c6, %c0_20] : memref<9x256xf32, #tpu.memory_space<vmem>>, vector<1x256xf32>
    %46 = vector.broadcast %45 : vector<1x256xf32> to vector<8x256xf32>
    %47 = arith.mulf %44, %46 : vector<8x256xf32>
    %cst_21 = arith.constant 0.000000e+00 : f32
    %48 = vector.broadcast %cst_21 : f32 to vector<8x16xf32>
    %49 = vector.extract_strided_slice %14 {offsets = [0, 16], sizes = [8, 240], strides = [1, 1]} : vector<8x256xf32> to vector<8x240xf32>
    %50 = tpu.concatenate %49, %48 in 1 : vector<8x240xf32>, vector<8x16xf32> -> vector<8x256xf32>
    %cst_22 = arith.constant 0.000000e+00 : f32
    %51 = vector.broadcast %cst_22 : f32 to vector<8x17xf32>
    %52 = vector.extract_strided_slice %14 {offsets = [0, 17], sizes = [8, 239], strides = [1, 1]} : vector<8x256xf32> to vector<8x239xf32>
    %53 = tpu.concatenate %52, %51 in 1 : vector<8x239xf32>, vector<8x17xf32> -> vector<8x256xf32>
    %c8 = arith.constant 8 : index
    %c0_23 = arith.constant 0 : index
    %54 = vector.load %arg4[%c8, %c0_23] : memref<9x256xf32, #tpu.memory_space<vmem>>, vector<1x256xf32>
    %55 = vector.broadcast %54 : vector<1x256xf32> to vector<8x256xf32>
    %56 = arith.mulf %53, %55 : vector<8x256xf32>
    %57 = tpu.concatenate %20, %23, %29, %35, %14, %41, %47, %50, %56 in 0 : vector<8x256xf32>, vector<8x256xf32>, vector<8x256xf32>, vector<8x256xf32>, vector<8x256xf32>, vector<8x256xf32>, vector<8x256xf32>, vector<8x256xf32>, vector<8x256xf32> -> vector<72x256xf32>
    %c0_24 = arith.constant 0 : index
    %c0_25 = arith.constant 0 : index
    %58 = vector.load %arg5[%c0_24, %c0_25] : memref<8x72xf32, #tpu.memory_space<vmem>>, vector<8x72xf32>
    %cst_26 = arith.constant dense<0.000000e+00> : vector<8x256xf32>
    %59 = tpu.matmul %58, %57, %cst_26 {dimension_numbers = #tpu.dot_dimension_numbers<[1], [0], [0], [1], [0, 0, 1, 1], [], []>} : vector<8x72xf32>, vector<72x256xf32>, vector<8x256xf32> -> vector<8x256xf32>
    %c0_27 = arith.constant 0 : index
    %c0_28 = arith.constant 0 : index
    %60 = vector.load %arg6[%c0_27, %c0_28] : memref<8x1xf32, #tpu.memory_space<vmem>>, vector<8x1xf32>
    %61 = vector.broadcast %60 : vector<8x1xf32> to vector<8x256xf32>
    %62 = arith.addf %59, %61 : vector<8x256xf32>
    %cst_29 = arith.constant 0.000000e+00 : f32
    %63 = vector.broadcast %cst_29 : f32 to vector<8x256xf32>
    %64 = arith.maximumf %62, %63 : vector<8x256xf32>
    %65 = vector.extract_strided_slice %64 {offsets = [0, 0], sizes = [4, 256], strides = [1, 1]} : vector<8x256xf32> to vector<4x256xf32>
    %66 = vector.extract_strided_slice %64 {offsets = [4, 0], sizes = [4, 256], strides = [1, 1]} : vector<8x256xf32> to vector<4x256xf32>
    %cst_30 = arith.constant dense<0.000000e+00> : vector<256xf32>
    %67 = vector.multi_reduction <add>, %65, %cst_30 [0] : vector<4x256xf32> to vector<256xf32>
    %68 = vector.shape_cast %67 : vector<256xf32> to vector<1x256xf32>
    %cst_31 = arith.constant 4.000000e+00 : f32
    %69 = vector.broadcast %cst_31 : f32 to vector<1x256xf32>
    %70 = arith.divf %68, %69 : vector<1x256xf32>
    %cst_32 = arith.constant dense<0xFF800000> : vector<256xf32>
    %71 = vector.multi_reduction <maximumf>, %65, %cst_32 [0] : vector<4x256xf32> to vector<256xf32>
    %72 = vector.shape_cast %71 : vector<256xf32> to vector<1x256xf32>
    %73 = tpu.concatenate %70, %72 in 0 : vector<1x256xf32>, vector<1x256xf32> -> vector<2x256xf32>
    %c0_33 = arith.constant 0 : index
    %c0_34 = arith.constant 0 : index
    %74 = vector.load %arg7[%c0_33, %c0_34] : memref<4x2xf32, #tpu.memory_space<vmem>>, vector<4x2xf32>
    %cst_35 = arith.constant dense<0.000000e+00> : vector<4x256xf32>
    %75 = tpu.matmul %74, %73, %cst_35 {dimension_numbers = #tpu.dot_dimension_numbers<[1], [0], [0], [1], [0, 0, 1, 1], [], []>} : vector<4x2xf32>, vector<2x256xf32>, vector<4x256xf32> -> vector<4x256xf32>
    %c0_36 = arith.constant 0 : index
    %c0_37 = arith.constant 0 : index
    %76 = vector.load %arg8[%c0_36, %c0_37] : memref<4x1xf32, #tpu.memory_space<vmem>>, vector<4x1xf32>
    %77 = vector.broadcast %76 : vector<4x1xf32> to vector<4x256xf32>
    %78 = arith.addf %75, %77 : vector<4x256xf32>
    %79 = arith.negf %78 : vector<4x256xf32>
    %80 = math.exp %79 : vector<4x256xf32>
    %cst_38 = arith.constant 1.000000e+00 : f32
    %81 = vector.broadcast %cst_38 : f32 to vector<4x256xf32>
    %82 = arith.addf %81, %80 : vector<4x256xf32>
    %83 = arith.divf %81, %82 : vector<4x256xf32>
    %84 = arith.mulf %65, %83 : vector<4x256xf32>
    %c0_39 = arith.constant 0 : index
    %c0_40 = arith.constant 0 : index
    %85 = vector.load %arg9[%c0_39, %c0_40] : memref<4x4xf32, #tpu.memory_space<vmem>>, vector<4x4xf32>
    %cst_41 = arith.constant dense<0.000000e+00> : vector<4x256xf32>
    %86 = tpu.matmul %85, %66, %cst_41 {dimension_numbers = #tpu.dot_dimension_numbers<[1], [0], [0], [1], [0, 0, 1, 1], [], []>} : vector<4x4xf32>, vector<4x256xf32>, vector<4x256xf32> -> vector<4x256xf32>
    %cst_42 = arith.constant dense<0.000000e+00> : vector<4xf32>
    %87 = vector.multi_reduction <add>, %86, %cst_42 [1] : vector<4x256xf32> to vector<4xf32>
    %88 = vector.shape_cast %87 : vector<4xf32> to vector<4x1xf32>
    %cst_43 = arith.constant 3.906250e-03 : f32
    %89 = vector.broadcast %cst_43 : f32 to vector<4x1xf32>
    %90 = arith.mulf %88, %89 : vector<4x1xf32>
    %91 = arith.negf %90 : vector<4x1xf32>
    %92 = math.exp %91 : vector<4x1xf32>
    %cst_44 = arith.constant 1.000000e+00 : f32
    %93 = vector.broadcast %cst_44 : f32 to vector<4x1xf32>
    %94 = arith.addf %93, %92 : vector<4x1xf32>
    %95 = arith.divf %93, %94 : vector<4x1xf32>
    %96 = vector.broadcast %95 : vector<4x1xf32> to vector<4x256xf32>
    %97 = arith.mulf %66, %96 : vector<4x256xf32>
    %c0_45 = arith.constant 0 : index
    %c0_46 = arith.constant 0 : index
    %98 = vector.load %arg10[%c0_45, %c0_46] : memref<8x4xf32, #tpu.memory_space<vmem>>, vector<8x4xf32>
    %99 = arith.addf %84, %97 : vector<4x256xf32>
    %cst_47 = arith.constant dense<0.000000e+00> : vector<8x256xf32>
    %100 = tpu.matmul %98, %99, %cst_47 {dimension_numbers = #tpu.dot_dimension_numbers<[1], [0], [0], [1], [0, 0, 1, 1], [], []>} : vector<8x4xf32>, vector<4x256xf32>, vector<8x256xf32> -> vector<8x256xf32>
    %c0_48 = arith.constant 0 : index
    %c0_49 = arith.constant 0 : index
    %101 = vector.load %arg11[%c0_48, %c0_49] : memref<8x1xf32, #tpu.memory_space<vmem>>, vector<8x1xf32>
    %102 = vector.broadcast %101 : vector<8x1xf32> to vector<8x256xf32>
    %103 = arith.addf %100, %102 : vector<8x256xf32>
    %c0_50 = arith.constant 0 : index
    %c0_51 = arith.constant 0 : index
    %c0_52 = arith.constant 0 : index
    %104 = vector.load %arg12[%c0_50, %c0_51, %c0_52] : memref<1x8x256xf32, #tpu.memory_space<vmem>>, vector<1x8x256xf32>
    %105 = vector.shape_cast %104 : vector<1x8x256xf32> to vector<8x256xf32>
    %106 = vector.shape_cast %103 : vector<8x256xf32> to vector<1x8x256xf32>
    tpu.vector_store %arg12[%c0_50, %c0_51, %c0_52], %106 {strides = array<i32>} : memref<1x8x256xf32, #tpu.memory_space<vmem>>, vector<1x8x256xf32>,
    return
  }
  func.func @transform_0(%arg0: i32) -> (i32, i32, i32) {
    %c0_i32 = arith.constant 0 : i32
    %c0_i32_0 = arith.constant 0 : i32
    %c0_i32_1 = arith.constant 0 : i32
    return %arg0, %c0_i32, %c0_i32_0 : i32, i32, i32
  }
  func.func @transform_1(%arg0: i32) -> (i32, i32, i32) {
    %c0_i32 = arith.constant 0 : i32
    %c0_i32_0 = arith.constant 0 : i32
    %c0_i32_1 = arith.constant 0 : i32
    return %arg0, %c0_i32, %c0_i32_0 : i32, i32, i32
  }
  func.func @transform_2(%arg0: i32) -> (i32, i32) {
    %c0_i32 = arith.constant 0 : i32
    %c0_i32_0 = arith.constant 0 : i32
    %c0_i32_1 = arith.constant 0 : i32
    return %c0_i32, %c0_i32_0 : i32, i32
  }
  func.func @transform_3(%arg0: i32) -> (i32, i32) {
    %c0_i32 = arith.constant 0 : i32
    %c0_i32_0 = arith.constant 0 : i32
    %c0_i32_1 = arith.constant 0 : i32
    return %c0_i32, %c0_i32_0 : i32, i32
  }
  func.func @transform_4(%arg0: i32) -> (i32, i32) {
    %c0_i32 = arith.constant 0 : i32
    %c0_i32_0 = arith.constant 0 : i32
    %c0_i32_1 = arith.constant 0 : i32
    return %c0_i32, %c0_i32_0 : i32, i32
  }
  func.func @transform_5(%arg0: i32) -> (i32, i32) {
    %c0_i32 = arith.constant 0 : i32
    %c0_i32_0 = arith.constant 0 : i32
    %c0_i32_1 = arith.constant 0 : i32
    return %c0_i32, %c0_i32_0 : i32, i32
  }
  func.func @transform_6(%arg0: i32) -> (i32, i32) {
    %c0_i32 = arith.constant 0 : i32
    %c0_i32_0 = arith.constant 0 : i32
    %c0_i32_1 = arith.constant 0 : i32
    return %c0_i32, %c0_i32_0 : i32, i32
  }
  func.func @transform_7(%arg0: i32) -> (i32, i32) {
    %c0_i32 = arith.constant 0 : i32
    %c0_i32_0 = arith.constant 0 : i32
    %c0_i32_1 = arith.constant 0 : i32
    return %c0_i32, %c0_i32_0 : i32, i32
  }
  func.func @transform_8(%arg0: i32) -> (i32, i32) {
    %c0_i32 = arith.constant 0 : i32
    %c0_i32_0 = arith.constant 0 : i32
    %c0_i32_1 = arith.constant 0 : i32
    return %c0_i32, %c0_i32_0 : i32, i32
  }
  func.func @transform_9(%arg0: i32) -> (i32, i32) {
    %c0_i32 = arith.constant 0 : i32
    %c0_i32_0 = arith.constant 0 : i32
    %c0_i32_1 = arith.constant 0 : i32
    return %c0_i32, %c0_i32_0 : i32, i32
  }
  func.func @transform_10(%arg0: i32) -> (i32, i32) {
    %c0_i32 = arith.constant 0 : i32
    %c0_i32_0 = arith.constant 0 : i32
    %c0_i32_1 = arith.constant 0 : i32
    return %c0_i32, %c0_i32_0 : i32, i32
  }
  func.func @transform_11(%arg0: i32) -> (i32, i32, i32) {
    %c0_i32 = arith.constant 0 : i32
    %c0_i32_0 = arith.constant 0 : i32
    %c0_i32_1 = arith.constant 0 : i32
    return %arg0, %c0_i32, %c0_i32_0 : i32, i32, i32
  }
}

</mosaic_0001>

<bundles_post_ra>
// kernel: tpu_custom_call.1
= control target key start
LH: loop header
LB: loop body
LE: loop exit
PB: predicated region body
PF: predicated region fallthrough
CT: control target
= control target key end

     0   :  { %s1957_s0 = inlined_call_operand.hbm [shape: f32[2,4,256], index: 0, kind: input, shape index: {}]   ;;  %s1958_s1 = inlined_call_operand.hbm [shape: f32[2,1,64], index: 1, kind: input, shape index: {}]   ;;  %s1959_s2 = inlined_call_operand.hbm [shape: f32[64,256], index: 2, kind: input, shape index: {}]   ;;  %s1960_s3 = inlined_call_operand.vmem [shape: f32[9,256], index: 3, kind: input, shape index: {}]   ;;  %s1961_s4 = inlined_call_operand.vmem [shape: f32[8,72], index: 4, kind: input, shape index: {}]   ;;  %s1962_s5 = inlined_call_operand.vmem [shape: f32[8,1], index: 5, kind: input, shape index: {}]   ;;  %s1963_s6 = inlined_call_operand.vmem [shape: f32[4,2], index: 6, kind: input, shape index: {}]   ;;  %s1964_s7 = inlined_call_operand.vmem [shape: f32[4,1], index: 7, kind: input, shape index: {}]   ;;  %s1965_s8 = inlined_call_operand.vmem [shape: f32[4,4], index: 8, kind: input, shape index: {}]   ;;  %s1966_s9 = inlined_call_operand.vmem [shape: f32[8,4], index: 9, kind: input, shape index: {}]   ;;  %s1967_s10 = inlined_call_operand.vmem [shape: f32[8,1], index: 10, kind: input, shape index: {}]   ;;  %s1968_s11 = inlined_call_operand.hbm [shape: f32[2,8,256], index: 11, kind: output, shape index: {}]  }
   0x1   :  { %1978 = sst [smem:[#allocation18_spill]] %s1959_s2 }
   0x2   :  { %16 = vsyncpa [#allocation3], 0 }
   0x3   :  { %18 = vsyncpa [#allocation3 + $0x1], 0 }
   0x4   :  { %19 = vsyncpa [#allocation6], 0 }
   0x5   :  { %21 = vsyncpa [#allocation6 + $0x1], 0 }
   0x6   :  { %22 = vsyncpa [#allocation4], 0 }
   0x7   :  { %24 = vsyncpa [#allocation4 + $0x1], 0  ;;  %s1639_s17 = smov 0   ;;  %s1641_s18 = smov 0  }
   0x8   :  { %s1643_s19 = smov 0   ;;  %s1645_s20 = smov 0  }
   0x9 LB: > { %1979 = sst [smem:[#allocation13_spill]] %s1549_s17  ;;  %s1660_s21 = sadd.s32 4294967295, %s1561_s20   ;;  %s1561_s20 = sphi %s1645_s20, %s2002_s20   ;;  %s1557_s19 = sphi %s1643_s19, %s2004_s19   ;;  %s1553_s18 = sphi %s1641_s18, %s2006_s18   ;;  %s1549_s17 = sphi %s1639_s17, %s2005_s17  }
   0xa   : > { %1980 = sst [smem:[#allocation14_spill]] %s1557_s19  ;;  %s1279_s22 = sadd.s32 4294967294, %s1561_s20  }
   0xb   : > { %p50_p0 = scmp.ne.s32.totalorder %s1553_s18, %s1549_s17  ;;  %p1972_p1 = scmp.eq.s32.totalorder %s1660_s21, 0 }
   0xc   : > { %p295_p3 = scmp.eq.s32.totalorder %s1279_s22, 1  ;;  %p1280_p5 = scmp.ge.s32.totalorder %s1561_s20, 1 }
   0xd   : > { %p1669_p4 = por %p1972_p1, %p50_p0  ;;  %p302_p7 = scmp.lt.s32.totalorder %s1561_s20, 3 }
   0xe   : > { %p1674_p6 = por %p295_p3, %p50_p0  ;;  %s1563_s26 = smov [#allocation7]  }
   0xf   : > { %s1981_s23 = scalar_select %p1669_p4, 1, 0 }
  0x10   : > { %s1982_s24 = scalar_select %p1674_p6, 1, 0 }
  0x11   : > { %p1679_p8 = pnand %p1280_p5, %p302_p7  ;;  %s314_s27 = sshll.u32 %s1563_s26, 4  ;;  %s315_s27 = int_to_ptr.vmem [resolvable:$true] %s314_s27 }
  0x12   : > { %1983 = sst [smem:[#allocation15_spill]] %s1982_s24  ;;  %s1693_s29 = sadd.s32 1, %s1561_s20  }
  0x13   : > { %s1984_s25 = scalar_select %p1679_p8, 1, 0 }
  0x14   : > { %p1330_p9 = pneg %p1679_p8  ;;  %1986 = sst [smem:[#allocation16_spill]] %s1693_s29 }
  0x15   : > { %s37_s30 = sadd.s32 1, %s1557_s19  ;;  %s34_s12 = ssub.s32 %s1561_s20, %s1693_s29 }
  0x16   : > { %p1688_p11 = pnand %p1330_p9, %p1972_p1  ;;  %s1418_s13 = scalar_lea.vmem %s315_s27, 2048 }
  0x17   : > { %p1419_p13 = scmp.ne.s32.totalorder %s315_s27, %s1418_s13  ;;  %p1426_p5 = scmp.lt.s32.totalorder %s315_s27, %s315_s27 }
  0x18   : > { %p1409_p12 = pneg %p1688_p11  ;;  %p1427_p7 = scmp.lt.s32.totalorder %s1418_s13, %s1418_s13 }
  0x1a   : > { %p1421_p0 = pnand %p1419_p13, %p1409_p12  ;;  %p1428_p10 = por %p1427_p7, %p1426_p5 }
  0x1c   : > { %p1422_p3 = pneg %p1421_p0 }
  0x1e   : > { %p1429_p2 = pnand %p1428_p10, %p1422_p3 }
  0x20   : > { %1432 = shalt.err (!%p1429_p2)
}
  0x21   : > { %s1564_s14 = smov 256   ;;  %s1565_s15 = smov 16  }
  0x22   : > { %s1987_s2 = sld [smem:[#allocation18_spill]]  ;;  %p35_p9 = scmp.eq.s32.totalorder %s34_s12, 0 }
  0x23   : > { %p44_p10 = scmp.ne.s32.totalorder %s1557_s19, %s1553_s18  ;;  %p45_p2 = scmp.eq.s32.totalorder %s1561_s20, 0 }
  0x24   : > { %p1346_p12 = scmp.lt.s32.totalorder %s1561_s20, 2  ;;  %p1989_p0 = scmp.eq.s32.totalorder %s1660_s21, 1 }
  0x25   : > { %s1710_s26 = scalar_select %p35_p9, %s1557_s19, %s37_s30  }
  0x26   : > { %p46_p13 = por %p45_p2, %p44_p10  ;;  %p1714_p3 = por %p1989_p0, %p44_p10 }
  0x27   : > { %1988 = sst [smem:[#allocation17_spill]] %s1710_s26  ;;  %s1719_s29 = sand.u32 1, %s1557_s19  }
  0x28   : > { %1333 = dma.hbm_to_vmem [thread:$0]  (!%p1688_p11), %s1987_s2, 2048, %s315_s27, [#allocation6], %s1564_s14, %s1564_s14, %s1565_s15  }
  0x29   : > { %s1990_s13 = scalar_select %p1714_p3, 1, 0 }
  0x2a   : > { %s1318_s28 = sshll.u32 %s1561_s20, 7  ;;  %s1283_s16 = sshll.u32 %s1719_s29, 3 }
  0x2b   : > { %s1726_s12 = scalar_lea.hbm %s1957_s0, %s1318_s28  ;;  %s356_s30 = scalar_lea.vmem [#allocation2], %s1283_s16 }
  0x2c   : > { %s364_s15 = sshll.u32 %s356_s30, 4  ;;  %p1728_p11 = pnand %p1346_p12, %p46_p13  ;;  %s365_s15 = int_to_ptr.vmem [resolvable:$true] %s364_s15 }
  0x2d   : > { %s353_s26 = scalar_lea.sflag [#allocation3], %s1719_s29  ;;  %s1433_s19 = scalar_lea.hbm %s1726_s12, 128 }
  0x2e   : > { %p1434_p5 = scmp.ne.s32.totalorder %s1726_s12, %s1433_s19  ;;  %p1435_p7 = pneg %p1728_p11 }
  0x2f   : > { %s1438_s27 = scalar_lea.hbm %s1957_s0, 256  ;;  %p1439_p2 = scmp.lt.s32.totalorder %s1726_s12, %s1957_s0 }
  0x30   : > { %p1436_p9 = pnand %p1435_p7, %p1434_p5  ;;  %p1440_p12 = scmp.lt.s32.totalorder %s1438_s27, %s1433_s19 }
  0x32   : > { %p1437_p10 = pneg %p1436_p9  ;;  %p1441_p13 = por %p1440_p12, %p1439_p2 }
  0x34   : > { %p1442_p0 = pnand %p1441_p13, %p1437_p10 }
  0x36   : > { %1445 = shalt.err (!%p1442_p0)
}
  0x37   : > { %s1446_s2 = scalar_lea.vmem %s365_s15, 128  ;;  %s1566_s24 = smov [#allocation2]  }
  0x38   : > { %p1447_p1 = scmp.ne.s32.totalorder %s365_s15, %s1446_s2  ;;  %s1451_s17 = sshll.u32 %s1566_s24, 4  ;;  %s1452_s17 = int_to_ptr.vmem [resolvable:$false] %s1451_s17 }
  0x39   : > { %s1453_s28 = scalar_lea.vmem %s1452_s17, 256  ;;  %p1454_p9 = scmp.lt.s32.totalorder %s365_s15, %s1452_s17 }
  0x3a   : > { %p1449_p6 = pnand %p1447_p1, %p1435_p7  ;;  %p1455_p3 = scmp.lt.s32.totalorder %s1453_s28, %s1446_s2 }
  0x3c   : > { %p1450_p5 = pneg %p1449_p6  ;;  %p1456_p4 = por %p1455_p3, %p1454_p9 }
  0x3e   : > { %p1457_p8 = pnand %p1456_p4, %p1450_p5 }
  0x40   : > { %1460 = shalt.err (!%p1457_p8)
}
  0x41   : > { %1337 = dma.hbm_to_vmem [thread:$0]  (!%p1728_p11), %s1726_s12, 128, %s365_s15, %s353_s26  }
  0x42   : > { %s1286_s19 = sshll.u32 %s1561_s20, 4  ;;  %s374_s2 = scalar_lea.vmem [#allocation5], %s1719_s29 }
  0x43   : > { %s1758_s24 = scalar_lea.hbm %s1958_s1, %s1286_s19  ;;  %s381_s17 = sshll.u32 %s374_s2, 4  ;;  %s382_s17 = int_to_ptr.vmem [resolvable:$true] %s381_s17 }
  0x44   : > { %s1992_s14 = sand.u32 1, %s1561_s20   ;;  %s1461_s28 = scalar_lea.hbm %s1758_s24, 16 }
  0x45   : > { %s372_s30 = scalar_lea.sflag [#allocation6], %s1992_s14  ;;  %p1462_p1 = scmp.ne.s32.totalorder %s1758_s24, %s1461_s28 }
  0x46   : > { %s1466_s15 = scalar_lea.hbm %s1958_s1, 32  ;;  %p1467_p8 = scmp.lt.s32.totalorder %s1758_s24, %s1958_s1 }
  0x47   : > { %p1464_p4 = pnand %p1462_p1, %p1435_p7  ;;  %p1468_p3 = scmp.lt.s32.totalorder %s1466_s15, %s1461_s28 }
  0x49   : > { %p1465_p6 = pneg %p1464_p4  ;;  %p1469_p10 = por %p1468_p3, %p1467_p8 }
  0x4b   : > { %p1470_p2 = pnand %p1469_p10, %p1465_p6 }
  0x4d   : > { %1473 = shalt.err (!%p1470_p2)
}
  0x4e   : > { %s1474_s29 = scalar_lea.vmem %s382_s17, 16  ;;  %s1567_s27 = smov [#allocation5]  }
  0x4f   : > { %p1475_p12 = scmp.ne.s32.totalorder %s382_s17, %s1474_s29  ;;  %s1479_s2 = sshll.u32 %s1567_s27, 4  ;;  %s1480_s2 = int_to_ptr.vmem [resolvable:$false] %s1479_s2 }
  0x50   : > { %s1481_s14 = scalar_lea.vmem %s1480_s2, 32  ;;  %p1482_p5 = scmp.lt.s32.totalorder %s382_s17, %s1480_s2 }
  0x51   : > { %p1477_p13 = pnand %p1475_p12, %p1435_p7  ;;  %p1483_p9 = scmp.lt.s32.totalorder %s1481_s14, %s1474_s29 }
  0x53   : > { %p1478_p0 = pneg %p1477_p13  ;;  %p1484_p1 = por %p1483_p9, %p1482_p5 }
  0x55   : > { %p1485_p4 = pnand %p1484_p1, %p1478_p0 }
  0x57   : > { %1488 = shalt.err (!%p1485_p4)
}
  0x58   : > { %1340 = dma.hbm_to_vmem [thread:$0]  (!%p1728_p11), %s1758_s24, 16, %s382_s17, %s372_s30  }
  0x59   : > { %p1993_p6 = scmp.ne.s32.totalorder %s1984_s25, 0 }
  0x5a   : > { %s1784_s28 = sand.u32 (!%p1993_p6), 1, %s1553_s18   ;;  %p1994_p7 = scmp.ne.s32.totalorder (!%p1993_p6), %s1981_s23, 0 }
  0x5b   : > { %390 = sbr.rel (%p1993_p6) target bundleno = 1268 (0x4f4), region = 64  ;;  %s1288_s26 = sshll.u32 (!%p1993_p6), %s1784_s28, 3 }
  0x5c   : > { %s393_s12 = scalar_lea.sflag (!%p1993_p6), [#allocation3], %s1784_s28  ;;  %s1788_s15 = scalar_lea.vmem (!%p1993_p6), [#allocation2], %s1288_s26 }
  0x60   : > { %1532 = dma.done.wait (%p1994_p7), %s393_s12, 128  }
  0x61   : > { %1534 = vsyncadd (%p1994_p7), %s393_s12, 4294967168  ;;  %s401_s25 = sand.u32 1, %s1660_s21   ;;  %s404_s24 = scalar_lea.vmem [#allocation5], %s1784_s28 }
  0x62   : > { %s402_s22 = scalar_lea.sflag [#allocation6], %s401_s25 }
  0x63   : > { %1536 = dma.done.wait (%p1994_p7), %s402_s22, 16  }
  0x64   : > { %1538 = vsyncadd (%p1994_p7), %s402_s22, 4294967280  ;;  %p1995_p11 = scmp.eq.s32.totalorder %s1660_s21, 0 }
  0x66   : > { %1540 = dma.done.wait (%p1995_p11), [#allocation6], 2048   ;;  %p1996_p8 = pmov %p1995_p11 }
  0x67   : > { %v1568_v0 = vmov 0.0   ;;  %v468_v1 = vld [vmem:[#allocation7 + $0x78] sm:$0xff]  ;;  %v467_v2 = vld [vmem:[#allocation7 + $0x70] sm:$0xff]  ;;  %v466_v3 = vld [vmem:[#allocation7 + $0x68] sm:$0xff]  ;;  %vm469_vm0 = vcmask 523264   ;;  %v546_v18 = vlaneseq  ;;  %vm580_vm1 = vcmask 1043456  }
  0x68   : > { %1542 = vsyncadd (%p1996_p8), [#allocation6], 4294965248  ;;  %537 = vmatprep.mubr.f32.mxu0 %v1568_v0  ;;  %821 = vmatprep.mubr.f32.mxu1 %v1568_v0  ;;  %v465_v4 = vld [vmem:[#allocation7 + $0x60] sm:$0xff]  ;;  %v464_v5 = vld [vmem:[#allocation7 + $0x58] sm:$0xff]  ;;  %s1569_s23 = smov 113   ;;  %s1570_s17 = smov 111  }
  0x69   : > { %489 = vmatprep.subr.mxu0 %v468_v1  ;;  %v463_v6 = vld [vmem:[#allocation7 + $0x50] sm:$0xff]  ;;  %v462_v7 = vld [vmem:[#allocation7 + $0x48] sm:$0xff]  ;;  %v461_v8 = vld [vmem:[#allocation7 + $0x40] sm:$0xff]  ;;  %v547_v19 = vshrl.u32 %v546_v18, 7  ;;  %s1571_s30 = smov 112   ;;  %s1572_s19 = smov 127  }
  0x6a   : > { %490 = vmatpush1.msra.mxu0 %v467_v2  ;;  %v460_v9 = vld [vmem:[#allocation7 + $0x38] sm:$0xff]  ;;  %v459_v10 = vld [vmem:[#allocation7 + $0x30] sm:$0xff]  ;;  %v458_v11 = vld [vmem:[#allocation7 + $0x28] sm:$0xff]  ;;  %s1573_s16 = smov 1   ;;  %s1574_s29 = smov 15   ;;  %v1575_v40 = vmov 0  }
  0x6b   : > { %491 = vmatprep.subr.mxu0 %v466_v3  ;;  %v457_v12 = vld [vmem:[#allocation7 + $0x20] sm:$0xff]  ;;  %v456_v13 = vld [vmem:[#allocation7 + $0x18] sm:$0xff]  ;;  %v455_v14 = vld [vmem:[#allocation7 + $0x10] sm:$0xff]  ;;  %v1809_v22 = vsub.s32 0, %v547_v19  ;;  %1394 = vset.pattern.permute.xlu0 %v1575_v40  ;;  %s1576_s27 = smov 17   ;;  %s1577_s2 = smov 16  }
  0x6c   : > { %492 = vmatpush1.msra.mxu0 %v465_v4  ;;  %v454_v15 = vld [vmem:[#allocation7 + $0x8] sm:$0xff]  ;;  %v453_v16 = vld [vmem:[#allocation7] sm:$0xff]  ;;  %v1847_v44 = vsub.s32 1, %v547_v19  ;;  %vm726_vm2 = vcmask 908288   ;;  %vm693_vm3 = vcmask 924672   ;;  %vm717_vm4 = vcmask 916480  }
  0x6d   : > { %493 = vmatprep.subr.mxu0 %v464_v5  ;;  %v452_v17 = vld [vmem:[%s404_s24] sm:$0x1]  ;;  %v1296_v45 = vld [vmem:[%s1960_s3 + $0x10] ss:$8 sm:$0x3]  ;;  %vm669_vm5 = vcmask 1039360  }
  0x6e   : > { %494 = vmatpush1.msra.mxu0 %v463_v6  ;;  %v451_v31 = vld [vmem:[%s1788_s15] sm:$0xff]  ;;  %v741_v46 = vrot.slane %v1296_v45, %v1847_v44  ;;  %v737_v52 = vrot.slane %v1296_v45, %v1809_v22  ;;  %vm645_vm6 = vcmask 7168   ;;  %vm621_vm7 = vcmask 121856   ;;  %s1166_s15 = scalar_lea.sflag [#allocation4], %s1784_s28  ;;  %p1997_p10 = scmp.ne.s32.totalorder %s1990_s13, 0 }
  0x6f   : > { %495 = vmatprep.subr.mxu0 %v462_v7  ;;  %v747_v41 = vld [vmem:[%s1962_s5] sm:$0xff]  ;;  %vm589_vm8 = vcmask 138240   ;;  %vm612_vm9 = vcmask 130048   ;;  %vm753_vm11 = vcmask 588800   ;;  %vm972_vm12 = vcmask 31744   ;;  %s1578_s22 = smov [#allocation8]  }
  0x70   : > { %496 = vmatpush1.msra.mxu0 %v461_v8  ;;  %v865_v42 = vld [vmem:[%s1964_s7] sm:$0xf]  ;;  %v1295_v50 = vld [vmem:[%s1960_s3 + $0x6] ss:$8 sm:$0x3]  ;;  %vm1298_vm10 = vmneg %vm612_vm9  ;;  %vm861_vm13 = vcmask 1040384  }
  0x71   : > { %497 = vmatprep.subr.mxu0 %v460_v9  ;;  %v1077_v43 = vld [vmem:[%s1967_s10] sm:$0xff]  ;;  %v708_v55 = vrot.slane %v1295_v50, %v1847_v44  ;;  %v704_v58 = vrot.slane %v1295_v50, %v1809_v22  ;;  %vm875_vm14 = vcmask 1041408   ;;  %vm871_vm15 = vcmask 15360  }
  0x72   : > { %498 = vmatpush1.msra.mxu0 %v459_v10  ;;  %v1294_v61 = vld [vmem:[%s1960_s3 + $0x5] ss:$8 sm:$0x3]  ;;  %v1293_v6 = vld [vmem:[%s1960_s3 + $0x3] ss:$8 sm:$0x3] }
  0x73   : > { %499 = vmatprep.subr.mxu0 %v458_v11  ;;  %v680_v4 = vrot.slane %v1294_v61, %v1809_v22  ;;  %v684_v5 = vrot.slane %v1294_v61, %v1847_v44 }
  0x74   : > { %500 = vmatpush1.msra.mxu0 %v457_v12 }
  0x75   : > { %501 = vmatprep.subr.mxu0 %v456_v13  ;;  %v656_v13 = vrot.slane %v1293_v6, %v1809_v22 }
  0x76   : > { %502 = vmatpush1.msra.mxu0 %v455_v14  ;;  %v660_v14 = vrot.slane %v1293_v6, %v1847_v44 }
  0x77   : > { %503 = vmatprep.subr.mxu0 %v454_v15  ;;  %v1292_v15 = vld [vmem:[%s1960_s3 + $0x2] ss:$8 sm:$0x3] }
  0x78   : > { %504 = vmatpush1.msra.mxu0 %v453_v16 }
  0x79   : > { %1291 = vmatmul.mubr.msk.f32.vlgmr.msra.gmra.mxu0 %vm469_vm0, %v452_v17 }
  0x7a   : > { %946 = vmatprep.mubr.f32.mxu0 %v1568_v0 }
 0x139   : > { %v539_v20 = vpop.f32.mrf.mxu0 }
 0x13a   : > { %v544_v21 = vsub.f32 1.0, %v539_v20  ;;  %v559_v23 = vadd.f32 1.0, %v539_v20 }
 0x13b   : > { %v541_v24 = vpop.f32.mrf.mxu0 }
 0x13c   : > { %v545_v25 = vsub.f32 1.0, %v541_v24  ;;  %v560_v26 = vadd.f32 1.0, %v541_v24  ;;  %v549_v27 = vrot.slane %v544_v21, %v1809_v22  ;;  %v564_v28 = vrot.slane %v559_v23, %v1809_v22 }
 0x13d   : > { %v632_v23 = vrot.slane %v1292_v15, %v1809_v22  ;;  %v636_v24 = vrot.slane %v1292_v15, %v1847_v44 }
 0x13e   : > { %v553_v29 = vrot.slane %v545_v25, %v1809_v22  ;;  %v568_v30 = vrot.slane %v560_v26, %v1809_v22 }
 0x140   : > { %v556_v32 = vcombine.low %v549_v27, %v553_v29  ;;  %v571_v33 = vcombine.low %v564_v28, %v568_v30 }
 0x142   : > { %v558_v34 = vmul.f32 %v556_v32, %v451_v31  ;;  %v573_v35 = vmul.f32 %v571_v33, %v451_v31  ;;  %v594_v31 = vld [vmem:[%s1960_s3] ss:$8 sm:$0x3] }
 0x144   : > { %v575_v36 = vcombine.high %v558_v34, %v558_v34  ;;  %v578_v37 = vcombine.low %v573_v35, %v573_v35 }
 0x146   : > { %v1817_v38 = vsel %vm580_vm1, %v575_v36, %v573_v35  ;;  %v1822_v39 = vsel %vm580_vm1, %v558_v34, %v578_v37  ;;  %v603_v34 = vrot.slane %v594_v31, %v1847_v44  ;;  %v599_v35 = vrot.slane %v594_v31, %v1809_v22 }
 0x147   : > { %691 = vrot.lane.b32.xlu1 %v1817_v38, %s1569_s23  ;;  %724 = vrot.lane.b32.xlu0 %v1817_v38, %s1570_s17 }
 0x14b   : > { %689 = vrot.lane.b32.xlu1 %v1822_v39, %s1569_s23  ;;  %722 = vrot.lane.b32.xlu0 %v1822_v39, %s1570_s17 }
 0x14f   : > { %715 = vrot.lane.b32.xlu1 %v1817_v38, %s1571_s30  ;;  %713 = vrot.lane.b32.xlu0 %v1822_v39, %s1571_s30 }
 0x153   : > { %665 = vrot.lane.b32.xlu1 %v1822_v39, %s1572_s19  ;;  %667 = vrot.lane.b32.xlu0 %v1817_v38, %s1572_s19 }
 0x157   : > { %643 = vrot.lane.b32.xlu1 %v1817_v38, %s1573_s16  ;;  %641 = vrot.lane.b32.xlu0 %v1822_v39, %s1573_s16  ;;  %s1290_s16 = sshll.u32 %s1784_s28, 4 }
 0x15b   : > { %619 = vrot.lane.b32.xlu1 %v1817_v38, %s1574_s29  ;;  %617 = vrot.lane.b32.xlu0 %v1822_v39, %s1574_s29  ;;  %s1319_s29 = sshll.u32 %s1660_s21, 8  ;;  %s1493_s21 = sshll.u32 %s1578_s22, 4  ;;  %s1494_s21 = int_to_ptr.vmem [resolvable:$false] %s1493_s21 }
 0x15c   : > { %s1178_s12 = scalar_lea.hbm %s1968_s11, %s1319_s29  ;;  %s1495_s24 = scalar_lea.vmem %s1494_s21, 512 }
 0x15f   : > { %587 = vrot.lane.b32.xlu1 %v1817_v38, %s1576_s27  ;;  %585 = vrot.lane.b32.xlu0 %v1822_v39, %s1576_s27  ;;  %s450_s27 = scalar_lea.vmem [#allocation8], %s1290_s16 }
 0x163   : > { %610 = vrot.lane.b32.xlu1 %v1817_v38, %s1577_s2  ;;  %608 = vrot.lane.b32.xlu0 %v1822_v39, %s1577_s2  ;;  %s1180_s2 = sshll.u32 %s450_s27, 4  ;;  %s1181_s2 = int_to_ptr.vmem [resolvable:$true] %s1180_s2 }
 0x164   : > { %s1489_s25 = scalar_lea.vmem %s1181_s2, 256  ;;  %p1496_p13 = scmp.lt.s32.totalorder %s1181_s2, %s1494_s21 }
 0x165   : > { %p1490_p3 = scmp.ne.s32.totalorder %s1181_s2, %s1489_s25  ;;  %p1497_p0 = scmp.lt.s32.totalorder %s1495_s24, %s1489_s25 }
 0x167   : > { %750 = vperm.xlu0 %1394, %v747_v41   ;;  %p1491_p2 = pnand %p1490_p3, %p1997_p10  ;;  %p1498_p5 = por %p1497_p0, %p1496_p13 }
 0x169   : > { %p1492_p12 = pneg %p1491_p2 }
 0x16b   : > { %868 = vperm.xlu0 %1394, %v865_v42   ;;  %p1499_p9 = pnand %p1498_p5, %p1492_p12 }
 0x16f   : > { %1080 = vperm.xlu0 %1394, %v1077_v43   ;;  %v746_v43 = vld [vmem:[%s1961_s4] sm:$0xff] }
 0x1b9   : > { %v692_v47 = vpop.permute.xlu1 %691  ;;  %v725_v48 = vpop.permute.xlu0 %724 }
 0x1ba   : > { %v730_v49 = vsel %vm726_vm2, %v725_v48, 0.0  ;;  %v697_v57 = vsel %vm693_vm3, %v692_v47, 0.0 }
 0x1bb   : > { %v745_v51 = vmul.f32 %v741_v46, %v730_v49  ;;  %v712_v1 = vmul.f32 %v708_v55, %v697_v57 }
 0x1bd   : > { %v690_v53 = vpop.permute.xlu1 %689  ;;  %771 = vmatprep.subr.mxu1 %v745_v51  ;;  %v723_v54 = vpop.permute.xlu0 %722 }
 0x1be   : > { %v727_v56 = vsel %vm726_vm2, %v723_v54, %v725_v48  ;;  %v694_v60 = vsel %vm693_vm3, %v690_v53, %v692_v47 }
 0x1bf   : > { %v744_v59 = vmul.f32 %v737_v52, %v727_v56  ;;  %v711_v3 = vmul.f32 %v704_v58, %v694_v60 }
 0x1c1   : > { %v716_v62 = vpop.permute.xlu1 %715  ;;  %772 = vmatpush1.msra.mxu1 %v744_v59  ;;  %v714_v63 = vpop.permute.xlu0 %713  ;;  %v967_v59 = vld [vmem:[%s1965_s8] sm:$0xf] }
 0x1c2   : > { %1297 = vmatprep.subr.msk.mxu1 %vm717_vm4, %v716_v62  ;;  %v718_v2 = vsel %vm717_vm4, %v714_v63, %v716_v62 }
 0x1c3   : > { %774 = vmatpush1.msra.mxu1 %v718_v2 }
 0x1c4   : > { %775 = vmatprep.subr.mxu1 %v712_v1 }
 0x1c5   : > { %v666_v7 = vpop.permute.xlu1 %665  ;;  %776 = vmatpush1.msra.mxu1 %v711_v3  ;;  %v668_v8 = vpop.permute.xlu0 %667 }
 0x1c6   : > { %v670_v9 = vsel %vm669_vm5, %v666_v7, %v668_v8  ;;  %v673_v10 = vsel %vm669_vm5, %v668_v8, 0.0 }
 0x1c7   : > { %v687_v11 = vmul.f32 %v680_v4, %v670_v9  ;;  %v688_v12 = vmul.f32 %v684_v5, %v673_v10 }
 0x1c9   : > { %v644_v16 = vpop.permute.xlu1 %643  ;;  %777 = vmatprep.subr.mxu1 %v688_v12  ;;  %v642_v17 = vpop.permute.xlu0 %641 }
 0x1ca   : > { %v646_v18 = vsel %vm645_vm6, %v642_v17, %v644_v16  ;;  %v649_v19 = vsel %vm645_vm6, 0.0, %v642_v17  ;;  %778 = vmatpush1.msra.mxu1 %v687_v11 }
 0x1cb   : > { %v663_v20 = vmul.f32 %v656_v13, %v649_v19  ;;  %v664_v21 = vmul.f32 %v660_v14, %v646_v18  ;;  %779 = vmatprep.subr.mxu1 %v1817_v38 }
 0x1cc   : > { %780 = vmatpush1.msra.mxu1 %v1822_v39 }
 0x1cd   : > { %v620_v25 = vpop.permute.xlu1 %619  ;;  %781 = vmatprep.subr.mxu1 %v664_v21  ;;  %v618_v26 = vpop.permute.xlu0 %617  ;;  %v864_v21 = vld [vmem:[%s1963_s6] sm:$0xf] }
 0x1ce   : > { %v622_v27 = vsel %vm621_vm7, %v618_v26, %v620_v25  ;;  %v625_v28 = vsel %vm621_vm7, 0.0, %v618_v26  ;;  %782 = vmatpush1.msra.mxu1 %v663_v20 }
 0x1cf   : > { %v639_v29 = vmul.f32 %v632_v23, %v625_v28  ;;  %v640_v30 = vmul.f32 %v636_v24, %v622_v27 }
 0x1d1   : > { %v588_v32 = vpop.permute.xlu1 %587  ;;  %783 = vmatprep.subr.mxu1 %v640_v30  ;;  %v586_v33 = vpop.permute.xlu0 %585 }
 0x1d2   : > { %784 = vmatpush1.msra.mxu1 %v639_v29  ;;  %v590_v36 = vsel %vm589_vm8, %v586_v33, %v588_v32  ;;  %v593_v37 = vsel %vm589_vm8, 0.0, %v586_v33 }
 0x1d3   : > { %v607_v41 = vmul.f32 %v603_v34, %v590_v36  ;;  %v606_v42 = vmul.f32 %v599_v35, %v593_v37 }
 0x1d5   : > { %v611_v38 = vpop.permute.xlu1 %610  ;;  %v609_v39 = vpop.permute.xlu0 %608 }
 0x1d6   : > { %v613_v40 = vsel %vm612_vm9, %v609_v39, %v611_v38 }
 0x1d7   : > { %785 = vmatprep.subr.mxu1 %v613_v40 }
 0x1d8   : > { %1299 = vmatpush1.msk.msra.mxu1 %vm1298_vm10, %v609_v39 }
 0x1d9   : > { %787 = vmatprep.subr.mxu1 %v607_v41 }
 0x1da   : > { %788 = vmatpush1.msra.mxu1 %v606_v42 }
 0x1db   : > { %1300 = vmatmul.mubr.msk.f32.vlgmr.msra.gmra.mxu1 %vm753_vm11, %v746_v43 }
 0x1dc   : > { %1044 = vmatprep.mubr.f32.mxu1 %v1568_v0 }
 0x1e2   : > { %v751_v22 = vpop.permute.xlu0 %750 }
 0x1e6   : > { %v869_v31 = vpop.permute.xlu0 %868 }
 0x29b   : > { %v823_v44 = vpop.f32.mrf.mxu1 }
 0x29c   : > { %v824_v45 = vadd.f32 %v823_v44, %v751_v22 }
 0x29d   : > { %v825_v46 = vpop.f32.mrf.mxu1 }
 0x29e   : > { %v1885_v47 = vmax.f32 %v824_v45, 0.0  ;;  %v826_v48 = vadd.f32 %v825_v46, %v751_v22 }
 0x2a0   : > { %v830_v49 = vsel %vm580_vm1, %v1885_v47, 0.0  ;;  %v847_v50 = vsel %vm580_vm1, %v1885_v47, -inf  ;;  %v1891_v51 = vmax.f32 %v826_v48, 0.0  ;;  %v970_v55 = vrot.slane %v1885_v47, 4 }
 0x2a1   : > { %v831_v52 = vrot.slane %v830_v49, 4  ;;  %v848_v53 = vrot.slane %v847_v50, 4 }
 0x2a2   : > { %v971_v54 = vrot.slane %v1891_v51, 4  ;;  %v837_v56 = vsel %vm580_vm1, %v1891_v51, 0.0  ;;  %v854_v57 = vsel %vm580_vm1, %v1891_v51, -inf }
 0x2a3   : > { %v832_v58 = vadd.f32 %v831_v52, %v830_v49  ;;  %v838_v60 = vrot.slane %v837_v56, 4  ;;  %v855_v61 = vrot.slane %v854_v57, 4  ;;  %v849_v62 = vmax.f32 %v847_v50, %v848_v53 }
 0x2a4   : > { %1306 = vmatprep.subr.msk.mxu1 %vm580_vm1, %v971_v54 }
 0x2a5   : > { %1307 = vmatpush1.msk.msra.mxu1 %vm580_vm1, %v970_v55  ;;  %v839_v63 = vadd.f32 %v838_v60, %v837_v56  ;;  %v856_v1 = vmax.f32 %v854_v57, %v855_v61  ;;  %v833_v2 = vrot.slane %v832_v58, 2  ;;  %v850_v3 = vrot.slane %v849_v62, 2  ;;  %v1068_v57 = vld [vmem:[%s1966_s9] sm:$0xff] }
 0x2a6   : > { %1308 = vmatmul.mubr.msk.f32.vlgmr.msra.gmra.mxu1 %vm972_vm12, %v967_v59 }
 0x2a7   : > { %v840_v4 = vrot.slane %v839_v63, 2  ;;  %v857_v5 = vrot.slane %v856_v1, 2  ;;  %v834_v6 = vadd.f32 %v833_v2, %v832_v58  ;;  %v851_v7 = vmax.f32 %v849_v62, %v850_v3  ;;  %v1081_v58 = vpop.permute.xlu0 %1080 }
 0x2a9   : > { %v841_v8 = vadd.f32 %v840_v4, %v839_v63  ;;  %v858_v9 = vmax.f32 %v856_v1, %v857_v5  ;;  %v835_v10 = vrot.slane %v834_v6, 1  ;;  %v852_v14 = vrot.slane %v851_v7, 1 }
 0x2ab   : > { %v842_v11 = vrot.slane %v841_v8, 1  ;;  %v859_v12 = vrot.slane %v858_v9, 1  ;;  %v836_v13 = vadd.f32 %v835_v10, %v834_v6  ;;  %v853_v19 = vmax.f32 %v851_v7, %v852_v14 }
 0x2ad   : > { %v843_v15 = vadd.f32 %v842_v11, %v841_v8  ;;  %v845_v16 = vmul.f32 0.25, %v836_v13  ;;  %v860_v18 = vmax.f32 %v858_v9, %v859_v12 }
 0x2af   : > { %v846_v17 = vmul.f32 0.25, %v843_v15  ;;  %v862_v23 = vsel %vm861_vm13, %v845_v16, %v853_v19 }
 0x2b1   : > { %v863_v20 = vsel %vm861_vm13, %v846_v17, %v860_v18 }
 0x2b2   : > { %1301 = vmatprep.subr.msk.mxu0 %vm875_vm14, %v863_v20 }
 0x2b3   : > { %1302 = vmatpush1.msk.msra.mxu0 %vm875_vm14, %v862_v23 }
 0x2b4   : > { %1303 = vmatmul.mubr.msk.f32.vlgmr.msra.gmra.mxu0 %vm871_vm15, %v864_v21 }
 0x2b5   : > { %1156 = vmatprep.mubr.f32.mxu0 %v1568_v0 }
 0x366   : > { %v1046_v24 = vpop.f32.mrf.mxu1 }
 0x367   : > { %v1051_v26 = vsel %vm580_vm1, %v1046_v24, 0.0 }
 0x368   : > { %v1048_v25 = vpop.f32.mrf.mxu1 }
 0x369   : > { %v1052_v27 = vsel %vm580_vm1, %v1048_v25, 0.0 }
 0x36a   : > { %v1053_v28 = vadd.f32 %v1052_v27, %v1051_v26 }
 0x36c   : > { %1054 = vadd.xlane.f32.xlu1 %v1053_v28 }
 0x374   : > { %v948_v29 = vpop.f32.mrf.mxu0 }
 0x375   : > { %v949_v32 = vadd.f32 %v948_v29, %v869_v31 }
 0x376   : > { %v950_v30 = vpop.f32.mrf.mxu0 }
 0x377   : > { %v951_v33 = vadd.f32 %v950_v30, %v869_v31  ;;  %v1304_v34 = vmul.f32 -1.442695, %v949_v32 }
 0x379   : > { %v1305_v35 = vmul.f32 -1.442695, %v951_v33  ;;  %1395 = vpow2.f32 %v1304_v34 }
 0x37b   : > { %1397 = vpow2.f32 %v1305_v35 }
 0x386   : > { %v1396_v38 = vpop.eup %1395 }
 0x387   : > { %v959_v41 = vadd.f32 1.0, %v1396_v38 }
 0x388   : > { %v1398_v39 = vpop.eup %1397 }
 0x389   : > { %v960_v42 = vadd.f32 1.0, %v1398_v39 }
 0x3f5   : > { %v1055_v36 = vpop.xlane.xlu1 %1054 }
 0x3f6   : > { %v1309_v37 = vmul.f32 -0.00390625, %v1055_v36 }
 0x3f8   : > { %v1058_v0 = vmul.f32 1.442695, %v1309_v37 }
 0x3fa   : > { %1399 = vpow2.f32 %v1058_v0 }
 0x407   : > { %v1400_v40 = vpop.eup %1399 }
 0x408   : > { %v1060_v43 = vadd.f32 1.0, %v1400_v40 }
 0x40a   : > { %1401 = vrcp.f32 %v1060_v43 }
 0x40b   : > { %1403 = vrcp.f32 %v959_v41 }
 0x40c   : > { %1405 = vrcp.f32 %v960_v42 }
 0x417   : > { %v1402_v22 = vpop.eup %1401 }
 0x418   : > { %v1404_v44 = vpop.eup %1403  ;;  %v1064_v45 = vrot.slane %v1402_v22, 4 }
 0x419   : > { %v1406_v46 = vpop.eup %1405  ;;  %v965_v54 = vmul.f32 %v1404_v44, %v1885_v47 }
 0x41a   : > { %v1066_v48 = vmul.f32 %v1064_v45, %v1885_v47  ;;  %v1067_v49 = vmul.f32 %v1064_v45, %v1891_v51  ;;  %v966_v52 = vmul.f32 %v1406_v46, %v1891_v51 }
 0x41c   : > { %v1071_v50 = vrot.slane %v1066_v48, 4  ;;  %v1072_v53 = vrot.slane %v1067_v49, 4 }
 0x41e   : > { %v1076_v55 = vadd.f32 %v1072_v53, %v966_v52  ;;  %v1075_v56 = vadd.f32 %v1071_v50, %v965_v54 }
 0x420   : > { %1310 = vmatprep.subr.msk.mxu0 %vm580_vm1, %v1076_v55 }
 0x421   : > { %1311 = vmatpush1.msk.msra.mxu0 %vm580_vm1, %v1075_v56 }
 0x422   : > { %1312 = vmatmul.mubr.msk.f32.vlgmr.msra.gmra.mxu0 %vm972_vm12, %v1068_v57 }
 0x4e2   : > { %v1158_v51 = vpop.f32.mrf.mxu0 }
 0x4e3   : > { %v1159_v47 = vadd.f32 %v1158_v51, %v1081_v58 }
 0x4e4   : > { %v1160_v59 = vpop.f32.mrf.mxu0 }
 0x4e5   : > { %1163 = vst [vmem:[%s450_s27] sm:$0xff] %v1159_v47  ;;  %v1161_v60 = vadd.f32 %v1160_v59, %v1081_v58 }
 0x4e7   : > { %1164 = vst [vmem:[%s450_s27 + $0x8] sm:$0xff] %v1161_v60 }
 0x4e8   : > { %1502 = shalt.err (!%p1499_p9)
}
 0x4e9   : > { %s1503_s23 = scalar_lea.hbm %s1178_s12, 256  ;;  %s1507_s30 = scalar_lea.hbm %s1968_s11, 512 }
 0x4ea   : > { %p1504_p1 = scmp.ne.s32.totalorder %s1178_s12, %s1503_s23  ;;  %p1508_p7 = scmp.lt.s32.totalorder %s1178_s12, %s1968_s11 }
 0x4eb   : > { %p1509_p11 = scmp.lt.s32.totalorder %s1507_s30, %s1503_s23 }
 0x4ec   : > { %p1505_p4 = pnand %p1504_p1, %p1997_p10 }
 0x4ed   : > { %p1510_p8 = por %p1509_p11, %p1508_p7 }
 0x4ee   : > { %p1506_p6 = pneg %p1505_p4 }
 0x4f0   : > { %p1511_p3 = pnand %p1510_p8, %p1506_p6 }
 0x4f2   : > { %1514 = shalt.err (!%p1511_p3)
}
 0x4f3   : > { %1328 = dma.vmem_to_hbm [thread:$0]  (%p1997_p10), %s1181_s2, 256, %s1178_s12, %s1166_s15  }
 0x4f4 PF: > { %s1998_s29 = sld [smem:[#allocation13_spill]]  ;;  %p2001_p12 = scmp.ge.s32.totalorder %s1561_s20, 2 }
 0x4f5   : > { %s1999_s27 = sld [smem:[#allocation15_spill]] }
 0x4fa   : > { %s1192_s14 = sand.u32 1, %s1998_s29  }
 0x4fb   : > { %p2000_p2 = scmp.ne.s32.totalorder %s1999_s27, 0  ;;  %s1193_s26 = scalar_lea.sflag [#allocation4], %s1192_s14 }
 0x4fd   : > { %p1342_p13 = pnand %p2001_p12, %p2000_p2 }
 0x4ff   : > { %p1343_p0 = pneg %p1342_p13 }
 0x501   : > { %1544 = dma.done.wait (%p1343_p0), %s1193_s26, 256  }
 0x502   : > { %1546 = vsyncadd (%p1343_p0), %s1193_s26, 4294967040  ;;  %s2002_s20 = sld [smem:[#allocation16_spill]]  ;;  %s2005_s17 = smov %s1553_s18 }
 0x503   : > { %s2003_s25 = sld [smem:[#allocation14_spill]] }
 0x504   : > { %s2004_s19 = sld [smem:[#allocation17_spill]] }
 0x508   : > { %p27_p5 = scmp.ge.s32.totalorder %s2002_s20, 4  }
 0x509   : > { %s2006_s18 = smov %s2003_s25 }
 0x50a   :  { %29 = sbr.rel (!%p27_p5) target bundleno = 9 (0x9), region = 131 }
 0x50f   :  { %1198 = vsyncpa [#allocation3], 1 }
 0x510   :  { %1200 = vsyncpa [#allocation3 + $0x1], 1 }
 0x511   :  { %1201 = vsyncpa [#allocation6], 1 }
 0x512   :  { %1203 = vsyncpa [#allocation6 + $0x1], 1 }
 0x513   :  { %1204 = vsyncpa [#allocation4], 1 }
 0x514   :  { %1206 = vsyncpa [#allocation4 + $0x1], 1 }

</bundles_post_ra>
